<compile_context>
chip_gen: v7x
topology: tpu7x:2x2x1
jax: 0.10.0
libtpu: 0.0.40
codegen_flags: <defaults>
</compile_context>

<pallas_src>
import math
import functools

import jax
import jax.numpy as jnp
from jax import lax
from jax.experimental import pallas as pl
from jax.experimental.pallas import tpu as pltpu

_NEG_INF = -1e30  # finite mask value: avoids NaNs from exp(-inf - (-inf))


# ----------------------------------------------------------------------------
# Hardware-aware tile selection
# ----------------------------------------------------------------------------
def _round_up(x, m):
    return ((x + m - 1) // m) * m


def _tpu_vmem_capacity_bytes():
    """Per-core VMEM capacity; conservative fallback (v7x: 64 MiB/TC)."""
    try:
        return int(pltpu.get_tpu_info().vmem_capacity_bytes)
    except Exception:
        return 64 * 1024 * 1024


def _mxu_tile_prefs():
    """Preferred (tq, tk): v5e has a 4x128x128 MXU -> tq=128; v6e/v7x -> 256."""
    kind = ""
    try:
        kind = jax.devices()[0].device_kind.lower()
    except Exception:
        pass
    if "v5 lite" in kind or "v5e" in kind or "v5lite" in kind:
        return 128, 256  # tq=128 (MXU shape), tk>=256 for DMA amortization
    return 256, 256


def _pick_tile(n, preferred):
    for t in (preferred, 256, 128, 64, 32, 16, 8):
        if t <= n and n % t == 0:
            return t
    return n  # odd/small length: whole axis (block == full dim is always legal)


def _tile_sizes(n_q, n_k, d, itemsize, budget, tq_pref, tk_pref):
    """Pick (tq, tk) keeping the per-step working set under `budget` bytes."""
    tq = _pick_tile(n_q, tq_pref)
    tk = _pick_tile(n_k, tk_pref)
    d_pad = _round_up(d, 128)  # lane padding for narrow head dims

    def est(tq_, tk_):
        # double-buffered q/o/k/v blocks
        io = 2 * (2 * tq_ + 2 * tk_) * d_pad * itemsize
        # f32 accumulator + lane-padded m/l scratch
        scratch = tq_ * d_pad * 4 + 2 * tq_ * 128 * 4
        # in-kernel (tq, tk) f32 temporaries: scores, probs, mask/working copies
        temps = 3 * tq_ * tk_ * 4
        return io + scratch + temps

    while est(tq, tk) > budget and tk > 8 and n_k % (tk // 2) == 0:
        tk //= 2
    while est(tq, tk) > budget and tq > 8 and n_q % (tq // 2) == 0:
        tq //= 2
    return tq, tk


# ----------------------------------------------------------------------------
# Kernel
# ----------------------------------------------------------------------------
def _mha_flash_kernel(q_ref, k_ref, v_ref, o_ref, m_ref, l_ref, acc_ref, *,
                      scale, is_causal, tq, tk):
    # q_ref: (1, tq, d); k_ref/v_ref: (1, tk, d); o_ref: (1, tq, d)
    # scratch: m_ref/l_ref (tq, 1) f32, acc_ref (tq, d) f32
    q_idx = pl.program_id(1)
    kv_idx = pl.program_id(2)

    @pl.when(kv_idx == 0)
    def _init():
        m_ref[...] = jnp.full_like(m_ref, -jnp.inf)
        l_ref[...] = jnp.zeros_like(l_ref)
        acc_ref[...] = jnp.zeros_like(acc_ref)

    def _compute():
        # Fold softmax scale into Q: (tq, d) multiply instead of (tq, tk).
        q_b = q_ref[0] * scale                       # native dtype (bf16 MXU fast path)
        k_b = k_ref[0]
        v_b = v_ref[0]

        # QK^T contracting d on both operands -> no explicit K transpose.
        s = lax.dot_general(
            q_b, k_b,
            dimension_numbers=(((1,), (1,)), ((), ())),
            preferred_element_type=jnp.float32)      # (tq, tk) f32

        if is_causal:
            row = lax.broadcasted_iota(jnp.int32, (tq, tk), 0) + q_idx * tq
            col = lax.broadcasted_iota(jnp.int32, (tq, tk), 1) + kv_idx * tk
            s = jnp.where(col <= row, s, _NEG_INF)

        # Online softmax update (stats in f32).
        m_prev = m_ref[...]                                       # (tq, 1)
        m_new = jnp.maximum(m_prev, jnp.max(s, axis=-1, keepdims=True))
        alpha = jnp.exp(m_prev - m_new)
        p = jnp.exp(s - m_new)                                    # unnormalized
        l_ref[...] = alpha * l_ref[...] + jnp.sum(p, axis=-1, keepdims=True)

        pv = lax.dot_general(
            p.astype(v_b.dtype), v_b,
            dimension_numbers=(((1,), (0,)), ((), ())),
            preferred_element_type=jnp.float32)                   # (tq, d) f32
        acc_ref[...] = alpha * acc_ref[...] + pv
        m_ref[...] = m_new

    if is_causal:
        # Skip kv tiles entirely above the diagonal.  Their K/V DMA is also
        # skipped because the clamped index_map keeps the block index constant.
        pl.when(kv_idx * tk <= q_idx * tq + (tq - 1))(_compute)
    else:
        _compute()

    @pl.when(kv_idx == pl.num_programs(2) - 1)
    def _finalize():
        # Runs once per q tile -> exact reciprocal is essentially free.
        inv_l = pl.reciprocal(l_ref[...], approx=False)
        o_ref[0] = (acc_ref[...] * inv_l).astype(o_ref.dtype)


# ----------------------------------------------------------------------------
# Module wrapper
# ----------------------------------------------------------------------------
class MHAttention:
    """JAX/Pallas port of tld.transformer_blocks.MHAttention (eval mode)."""

    def __init__(self, is_causal=False, dropout_level=0, n_heads=4):
        self.is_causal = is_causal
        self.dropout_level = dropout_level  # TODO(synk): training-time dropout not implemented (eval: p=0)
        self.n_heads = n_heads

    def __call__(self, q, k, v, attn_mask=None, block_q=None, block_k=None):
        # TODO(synk): attn_mask not supported (module is exercised with attn_mask=None)
        assert attn_mask is None, "attn_mask not supported in this kernel"
        assert q.shape[-1] == k.shape[-1]
        assert k.shape[-2] == v.shape[-2]

        bs, n_q, hidden = q.shape
        n_k = k.shape[-2]
        h = self.n_heads
        d = hidden // h
        assert h * d == hidden

        # Wrapper-side head split: (bs, n, h*d) -> (bs*h, n, d).  Layout plumbing
        # in XLA; the kernel then works on full-lane-width per-head blocks
        # instead of slicing sub-128 lanes per head per kv tile.
        def split_heads(x, n):
            return x.reshape(bs, n, h, d).transpose(0, 2, 1, 3).reshape(bs * h, n, d)

        qh = split_heads(q, n_q)
        kh = split_heads(k, n_k)
        vh = split_heads(v, n_k)

        # Generation-aware VMEM budget / tile sizes.
        vmem_cap = _tpu_vmem_capacity_bytes()
        vmem_limit = min(int(vmem_cap * 3 // 4), 100 * 1024 * 1024)
        budget = int(vmem_limit * 0.7)
        tq_pref, tk_pref = _mxu_tile_prefs()
        tq, tk = _tile_sizes(n_q, n_k, d, q.dtype.itemsize, budget, tq_pref, tk_pref)
        if block_q is not None:
            tq = block_q
        if block_k is not None:
            tk = block_k
        assert n_q % tq == 0 and n_k % tk == 0

        kernel = functools.partial(
            _mha_flash_kernel,
            scale=1.0 / math.sqrt(d), is_causal=self.is_causal, tq=tq, tk=tk)

        grid = (bs * h, n_q // tq, n_k // tk)

        q_index_map = lambda b, qi, ki: (b, qi, 0)
        if self.is_causal:
            # Clamp above-diagonal kv tiles to the last needed block: the block
            # index stops changing, so the pipeline skips the K/V DMA too.
            kv_index_map = lambda b, qi, ki: (
                b, jnp.minimum(ki, (qi * tq + (tq - 1)) // tk), 0)
        else:
            kv_index_map = lambda b, qi, ki: (b, ki, 0)

        flops = 4 * bs * h * n_q * n_k * d
        if self.is_causal:
            flops //= 2
        cost = pl.CostEstimate(
            flops=flops,
            transcendentals=bs * h * n_q * n_k,
            bytes_accessed=(q.size + k.size + v.size + bs * n_q * hidden)
                           * q.dtype.itemsize)

        out = pl.pallas_call(
            kernel,
            out_shape=jax.ShapeDtypeStruct((bs * h, n_q, d), q.dtype),
            grid=grid,
            in_specs=[
                pl.BlockSpec((1, tq, d), q_index_map),
                pl.BlockSpec((1, tk, d), kv_index_map),
                pl.BlockSpec((1, tk, d), kv_index_map),
            ],
            out_specs=pl.BlockSpec((1, tq, d), q_index_map),
            scratch_shapes=[
                pltpu.VMEM((tq, 1), jnp.float32),   # running max  m
                pltpu.VMEM((tq, 1), jnp.float32),   # running sum  l
                pltpu.VMEM((tq, d), jnp.float32),   # output accumulator
            ],
            compiler_params=pltpu.CompilerParams(
                dimension_semantics=("parallel", "parallel", "arbitrary"),
                vmem_limit_bytes=vmem_limit),
            cost_estimate=cost,
        )(qh, kh, vh)

        # (bs*h, n_q, d) -> (bs, n_q, h*d)
        return out.reshape(bs, h, n_q, d).transpose(0, 2, 1, 3).reshape(bs, n_q, hidden)


# ----------------------------------------------------------------------------
# Reference + tests
# ----------------------------------------------------------------------------
def _reference(q, k, v, n_heads, is_causal):
    bs, n_q, hd = q.shape
    n_k = k.shape[-2]
    d = hd // n_heads
    qh = q.reshape(bs, n_q, n_heads, d).transpose(0, 2, 1, 3).astype(jnp.float32)
    kh = k.reshape(bs, n_k, n_heads, d).transpose(0, 2, 1, 3).astype(jnp.float32)
    vh = v.reshape(bs, n_k, n_heads, d).transpose(0, 2, 1, 3).astype(jnp.float32)
    s = jnp.einsum("bhqd,bhkd->bhqk", qh, kh) / math.sqrt(d)
    if is_causal:
        mask = jnp.tril(jnp.ones((n_q, n_k), dtype=bool))
        s = jnp.where(mask, s, -jnp.inf)
    p = jax.nn.softmax(s, axis=-1)
    o = jnp.einsum("bhqk,bhkd->bhqd", p, vh)
    return o.transpose(0, 2, 1, 3).reshape(bs, n_q, hd)


if __name__ == "__main__":
    key = jax.random.PRNGKey(0)
    kq, kk, kv = jax.random.split(key, 3)

    bs, seq, n_heads, head_dim = 2, 8, 4, 8
    hidden = n_heads * head_dim  # 32

    q = jax.random.normal(kq, (bs, seq, hidden), dtype=jnp.float32)
    k = jax.random.normal(kk, (bs, seq, hidden), dtype=jnp.float32)
    v = jax.random.normal(kv, (bs, seq, hidden), dtype=jnp.float32)

    # 1) non-causal, f32, single tile
    attn = MHAttention(is_causal=False, dropout_level=0, n_heads=n_heads)
    out = attn(q, k, v)
    jax.block_until_ready(out)
    ref = _reference(q, k, v, n_heads, is_causal=False)
    assert out.shape == (bs, seq, hidden)
    err = jnp.max(jnp.abs(out - ref))
    assert jnp.allclose(out, ref, atol=2e-2, rtol=2e-2), f"max err {err}"

    # 2) causal, f32, multiple q/kv tiles (exercises online softmax, causal
    #    compute skip and the clamped K/V index_map DMA skip)
    seq2 = 32
    q2 = jax.random.normal(kq, (bs, seq2, hidden), dtype=jnp.float32)
    k2 = jax.random.normal(kk, (bs, seq2, hidden), dtype=jnp.float32)
    v2 = jax.random.normal(kv, (bs, seq2, hidden), dtype=jnp.float32)
    attn_c = MHAttention(is_causal=True, dropout_level=0, n_heads=n_heads)
    out2 = attn_c(q2, k2, v2, block_q=16, block_k=8)
    jax.block_until_ready(out2)
    ref2 = _reference(q2, k2, v2, n_heads, is_causal=True)
    err2 = jnp.max(jnp.abs(out2 - ref2))
    assert jnp.allclose(out2, ref2, atol=2e-2, rtol=2e-2), f"max err {err2}"

    # 3) bf16 smoke test (MXU bf16 fast path)
    out3 = attn(q.astype(jnp.bfloat16), k.astype(jnp.bfloat16), v.astype(jnp.bfloat16))
    jax.block_until_ready(out3)
    assert jnp.allclose(out3.astype(jnp.float32), ref, atol=1e-1, rtol=1e-1)

    print("KERNEL_OK")
</pallas_src>

<mosaic_0001>
module attributes {stable_mosaic.version = 11 : i64} {
  func.func @_mha_flash_kernel(%arg0: i32, %arg1: i32, %arg2: i32, %arg3: memref<1x8x8xf32, #tpu.memory_space<vmem>>, %arg4: memref<1x8x8xf32, #tpu.memory_space<vmem>>, %arg5: memref<1x8x8xf32, #tpu.memory_space<vmem>>, %arg6: memref<1x8x8xf32, #tpu.memory_space<vmem>>, %arg7: memref<8x1xf32, #tpu.memory_space<vmem>>, %arg8: memref<8x1xf32, #tpu.memory_space<vmem>>, %arg9: memref<8x8xf32, #tpu.memory_space<vmem>>) attributes {dimension_semantics = [#tpu.dimension_semantics<parallel>, #tpu.dimension_semantics<parallel>, #tpu.dimension_semantics<arbitrary>], iteration_bounds = array<i64: 8, 1, 1>, scalar_prefetch = 0 : i64, scratch_operands = 3 : i64, tpu.core_type = #tpu.core_type<tc>, window_params = [{transform_indices = @transform_0, window_bounds = array<i64: 1, 8, 8>}, {transform_indices = @transform_1, window_bounds = array<i64: 1, 8, 8>}, {transform_indices = @transform_2, window_bounds = array<i64: 1, 8, 8>}, {transform_indices = @transform_3, window_bounds = array<i64: 1, 8, 8>}]} {
    %c0_i32 = arith.constant 0 : i32
    %0 = arith.cmpi eq, %arg2, %c0_i32 : i32
    %1 = arith.extui %0 : i1 to i32
    %c0_i32_0 = arith.constant 0 : i32
    %2 = arith.cmpi ne, %1, %c0_i32_0 : i32
    scf.if %2 {
      %cst_27 = arith.constant 0xFF800000 : f32
      %37 = vector.broadcast %cst_27 : f32 to vector<8x1xf32>
      %c0_28 = arith.constant 0 : index
      %c0_29 = arith.constant 0 : index
      %38 = vector.load %arg7[%c0_28, %c0_29] : memref<8x1xf32, #tpu.memory_space<vmem>>, vector<8x1xf32>
      tpu.vector_store %arg7[%c0_28, %c0_29], %37 {strides = array<i32>} : memref<8x1xf32, #tpu.memory_space<vmem>>, vector<8x1xf32>,
      %cst_30 = arith.constant 0.000000e+00 : f32
      %39 = vector.broadcast %cst_30 : f32 to vector<8x1xf32>
      %c0_31 = arith.constant 0 : index
      %c0_32 = arith.constant 0 : index
      %40 = vector.load %arg8[%c0_31, %c0_32] : memref<8x1xf32, #tpu.memory_space<vmem>>, vector<8x1xf32>
      tpu.vector_store %arg8[%c0_31, %c0_32], %39 {strides = array<i32>} : memref<8x1xf32, #tpu.memory_space<vmem>>, vector<8x1xf32>,
      %cst_33 = arith.constant 0.000000e+00 : f32
      %41 = vector.broadcast %cst_33 : f32 to vector<8x8xf32>
      %c0_34 = arith.constant 0 : index
      %c0_35 = arith.constant 0 : index
      %42 = vector.load %arg9[%c0_34, %c0_35] : memref<8x8xf32, #tpu.memory_space<vmem>>, vector<8x8xf32>
      tpu.vector_store %arg9[%c0_34, %c0_35], %41 {strides = array<i32>} : memref<8x8xf32, #tpu.memory_space<vmem>>, vector<8x8xf32>,
    } else {
    }
    %c0 = arith.constant 0 : index
    %c0_1 = arith.constant 0 : index
    %c0_2 = arith.constant 0 : index
    %3 = vector.load %arg3[%c0, %c0_1, %c0_2] : memref<1x8x8xf32, #tpu.memory_space<vmem>>, vector<1x8x8xf32>
    %4 = vector.shape_cast %3 : vector<1x8x8xf32> to vector<8x8xf32>
    %cst = arith.constant 0.353553385 : f32
    %5 = vector.broadcast %cst : f32 to vector<8x8xf32>
    %6 = arith.mulf %4, %5 : vector<8x8xf32>
    %c0_3 = arith.constant 0 : index
    %c0_4 = arith.constant 0 : index
    %c0_5 = arith.constant 0 : index
    %7 = vector.load %arg4[%c0_3, %c0_4, %c0_5] : memref<1x8x8xf32, #tpu.memory_space<vmem>>, vector<1x8x8xf32>
    %8 = vector.shape_cast %7 : vector<1x8x8xf32> to vector<8x8xf32>
    %c0_6 = arith.constant 0 : index
    %c0_7 = arith.constant 0 : index
    %c0_8 = arith.constant 0 : index
    %9 = vector.load %arg5[%c0_6, %c0_7, %c0_8] : memref<1x8x8xf32, #tpu.memory_space<vmem>>, vector<1x8x8xf32>
    %10 = vector.shape_cast %9 : vector<1x8x8xf32> to vector<8x8xf32>
    %cst_9 = arith.constant dense<0.000000e+00> : vector<8x8xf32>
    %11 = tpu.matmul %6, %8, %cst_9 {dimension_numbers = #tpu.dot_dimension_numbers<[1], [1], [0], [0], [0, 0, 1, 0], [], []>} : vector<8x8xf32>, vector<8x8xf32>, vector<8x8xf32> -> vector<8x8xf32>
    %c0_10 = arith.constant 0 : index
    %c0_11 = arith.constant 0 : index
    %12 = vector.load %arg7[%c0_10, %c0_11] : memref<8x1xf32, #tpu.memory_space<vmem>>, vector<8x1xf32>
    %cst_12 = arith.constant dense<0xFF800000> : vector<8xf32>
    %13 = vector.multi_reduction <maximumf>, %11, %cst_12 [1] : vector<8x8xf32> to vector<8xf32>
    %14 = vector.shape_cast %13 : vector<8xf32> to vector<8x1xf32>
    %15 = arith.maximumf %12, %14 : vector<8x1xf32>
    %16 = arith.subf %12, %15 : vector<8x1xf32>
    %17 = math.exp %16 : vector<8x1xf32>
    %18 = vector.broadcast %15 : vector<8x1xf32> to vector<8x8xf32>
    %19 = arith.subf %11, %18 : vector<8x8xf32>
    %20 = math.exp %19 : vector<8x8xf32>
    %c0_13 = arith.constant 0 : index
    %c0_14 = arith.constant 0 : index
    %21 = vector.load %arg8[%c0_13, %c0_14] : memref<8x1xf32, #tpu.memory_space<vmem>>, vector<8x1xf32>
    %22 = arith.mulf %17, %21 : vector<8x1xf32>
    %cst_15 = arith.constant dense<0.000000e+00> : vector<8xf32>
    %23 = vector.multi_reduction <add>, %20, %cst_15 [1] : vector<8x8xf32> to vector<8xf32>
    %24 = vector.shape_cast %23 : vector<8xf32> to vector<8x1xf32>
    %25 = arith.addf %22, %24 : vector<8x1xf32>
    %c0_16 = arith.constant 0 : index
    %c0_17 = arith.constant 0 : index
    %26 = vector.load %arg8[%c0_16, %c0_17] : memref<8x1xf32, #tpu.memory_space<vmem>>, vector<8x1xf32>
    tpu.vector_store %arg8[%c0_16, %c0_17], %25 {strides = array<i32>} : memref<8x1xf32, #tpu.memory_space<vmem>>, vector<8x1xf32>,
    %cst_18 = arith.constant dense<0.000000e+00> : vector<8x8xf32>
    %27 = tpu.matmul %20, %10, %cst_18 {dimension_numbers = #tpu.dot_dimension_numbers<[1], [0], [0], [1], [0, 0, 1, 1], [], []>} : vector<8x8xf32>, vector<8x8xf32>, vector<8x8xf32> -> vector<8x8xf32>
    %c0_19 = arith.constant 0 : index
    %c0_20 = arith.constant 0 : index
    %28 = vector.load %arg9[%c0_19, %c0_20] : memref<8x8xf32, #tpu.memory_space<vmem>>, vector<8x8xf32>
    %29 = vector.broadcast %17 : vector<8x1xf32> to vector<8x8xf32>
    %30 = arith.mulf %29, %28 : vector<8x8xf32>
    %31 = arith.addf %30, %27 : vector<8x8xf32>
    %c0_21 = arith.constant 0 : index
    %c0_22 = arith.constant 0 : index
    %32 = vector.load %arg9[%c0_21, %c0_22] : memref<8x8xf32, #tpu.memory_space<vmem>>, vector<8x8xf32>
    tpu.vector_store %arg9[%c0_21, %c0_22], %31 {strides = array<i32>} : memref<8x8xf32, #tpu.memory_space<vmem>>, vector<8x8xf32>,
    %c0_23 = arith.constant 0 : index
    %c0_24 = arith.constant 0 : index
    %33 = vector.load %arg7[%c0_23, %c0_24] : memref<8x1xf32, #tpu.memory_space<vmem>>, vector<8x1xf32>
    tpu.vector_store %arg7[%c0_23, %c0_24], %15 {strides = array<i32>} : memref<8x1xf32, #tpu.memory_space<vmem>>, vector<8x1xf32>,
    %c0_i32_25 = arith.constant 0 : i32
    %34 = arith.cmpi eq, %arg2, %c0_i32_25 : i32
    %35 = arith.extui %34 : i1 to i32
    %c0_i32_26 = arith.constant 0 : i32
    %36 = arith.cmpi ne, %35, %c0_i32_26 : i32
    scf.if %36 {
      %c0_27 = arith.constant 0 : index
      %c0_28 = arith.constant 0 : index
      %37 = vector.load %arg8[%c0_27, %c0_28] : memref<8x1xf32, #tpu.memory_space<vmem>>, vector<8x1xf32>
      %38 = tpu.reciprocal %37 : vector<8x1xf32> -> vector<8x1xf32>
      %c0_29 = arith.constant 0 : index
      %c0_30 = arith.constant 0 : index
      %39 = vector.load %arg9[%c0_29, %c0_30] : memref<8x8xf32, #tpu.memory_space<vmem>>, vector<8x8xf32>
      %40 = vector.broadcast %38 : vector<8x1xf32> to vector<8x8xf32>
      %41 = arith.mulf %39, %40 : vector<8x8xf32>
      %c0_31 = arith.constant 0 : index
      %c0_32 = arith.constant 0 : index
      %c0_33 = arith.constant 0 : index
      %42 = vector.load %arg6[%c0_31, %c0_32, %c0_33] : memref<1x8x8xf32, #tpu.memory_space<vmem>>, vector<1x8x8xf32>
      %43 = vector.shape_cast %42 : vector<1x8x8xf32> to vector<8x8xf32>
      %44 = vector.shape_cast %41 : vector<8x8xf32> to vector<1x8x8xf32>
      tpu.vector_store %arg6[%c0_31, %c0_32, %c0_33], %44 {strides = array<i32>} : memref<1x8x8xf32, #tpu.memory_space<vmem>>, vector<1x8x8xf32>,
    } else {
    }
    return
  }
  func.func @transform_0(%arg0: i32, %arg1: i32, %arg2: i32) -> (i32, i32, i32) {
    %c0_i32 = arith.constant 0 : i32
    %c0_i32_0 = arith.constant 0 : i32
    return %arg0, %arg1, %c0_i32 : i32, i32, i32
  }
  func.func @transform_1(%arg0: i32, %arg1: i32, %arg2: i32) -> (i32, i32, i32) {
    %c0_i32 = arith.constant 0 : i32
    %c0_i32_0 = arith.constant 0 : i32
    return %arg0, %arg2, %c0_i32 : i32, i32, i32
  }
  func.func @transform_2(%arg0: i32, %arg1: i32, %arg2: i32) -> (i32, i32, i32) {
    %c0_i32 = arith.constant 0 : i32
    %c0_i32_0 = arith.constant 0 : i32
    return %arg0, %arg2, %c0_i32 : i32, i32, i32
  }
  func.func @transform_3(%arg0: i32, %arg1: i32, %arg2: i32) -> (i32, i32, i32) {
    %c0_i32 = arith.constant 0 : i32
    %c0_i32_0 = arith.constant 0 : i32
    return %arg0, %arg1, %c0_i32 : i32, i32, i32
  }
}

</mosaic_0001>

<bundles_post_ra>
// kernel: tpu_custom_call.1
= control target key start
LH: loop header
LB: loop body
LE: loop exit
PB: predicated region body
PF: predicated region fallthrough
CT: control target
= control target key end

     0   :  { %s1240_s0 = inlined_call_operand.hbm [shape: f32[8,8,8], index: 0, kind: input, shape index: {}]   ;;  %s1241_s1 = inlined_call_operand.hbm [shape: f32[8,8,8], index: 1, kind: input, shape index: {}]   ;;  %s1242_s2 = inlined_call_operand.hbm [shape: f32[8,8,8], index: 2, kind: input, shape index: {}]   ;;  %s1243_s3 = inlined_call_operand.hbm [shape: f32[8,8,8], index: 3, kind: output, shape index: {}]  }
   0x1   :  { %1249 = sst [smem:[#allocation18_spill]] %s1241_s1 }
   0x2   :  { %8 = vsyncpa [#allocation6], 0 }
   0x3   :  { %10 = vsyncpa [#allocation6 + $0x1], 0 }
   0x4   :  { %11 = vsyncpa [#allocation9], 0 }
   0x5   :  { %13 = vsyncpa [#allocation9 + $0x1], 0 }
   0x6   :  { %14 = vsyncpa [#allocation7], 0 }
   0x7   :  { %16 = vsyncpa [#allocation7 + $0x1], 0  ;;  %s966_s12 = smov 0   ;;  %s968_s13 = smov 0  }
   0x8   :  { %s970_s14 = smov 0   ;;  %s972_s15 = smov 0  }
   0x9   :  { %s974_s16 = smov 0   ;;  %s976_s17 = smov 0  }
   0xa LB: > { %1250 = sst [smem:[#allocation15_spill]] %s932_s16  ;;  %s997_s18 = sadd.s32 4294967295, %s936_s17   ;;  %s936_s17 = sphi %s976_s17, %s22_s17   ;;  %s932_s16 = sphi %s974_s16, %s1270_s16   ;;  %s928_s15 = sphi %s972_s15, %s1269_s15   ;;  %s924_s14 = sphi %s970_s14, %s1273_s14   ;;  %s920_s13 = sphi %s968_s13, %s1272_s13   ;;  %s916_s12 = sphi %s966_s12, %s1271_s12  }
   0xb   : > { %s641_s19 = sadd.s32 4294967294, %s936_s17   ;;  %s41_s20 = sadd.s32 1, %s932_s16 }
   0xc   : > { %s50_s21 = sadd.s32 1, %s924_s14  ;;  %p43_p0 = scmp.ge.s32.totalorder %s41_s20, 8 }
   0xd   : > { %p57_p1 = scmp.ne.s32.totalorder %s924_s14, %s920_s13  ;;  %p58_p2 = scmp.eq.s32.totalorder %s936_s17, 0 }
   0xe   : > { %p63_p3 = scmp.ne.s32.totalorder %s920_s13, %s916_s12  ;;  %s1275_s20 = smov (%p43_p0, %s41_s20), 0 }
   0xf   : > { %1251 = sst [smem:[#allocation16_spill]] %s1275_s20  ;;  %p1009_p4 = por %p58_p2, %p57_p1 }
  0x10   : > { %p64_p5 = scmp.eq.s32.totalorder %s997_s18, 0  ;;  %s45_s23 = ssub.s32 %s932_s16, %s1275_s20 }
  0x11   : > { %p145_p6 = scmp.eq.s32.totalorder %s997_s18, 7  ;;  %p48_p7 = scmp.eq.s32.totalorder %s45_s23, 0 }
  0x12   : > { %p1017_p8 = por %p64_p5, %p63_p3  ;;  %p151_p10 = scmp.eq.s32.totalorder %s641_s19, 7 }
  0x13   : > { %p1021_p9 = por %p145_p6, %p57_p1  ;;  %p698_p12 = scmp.lt.s32.totalorder %s936_s17, 8 }
  0x14   : > { %s1253_s24 = scalar_select %p1017_p8, 1, 0 }
  0x15   : > { %s1254_s25 = scalar_select %p1021_p9, 1, 0 }
  0x16   : > { %s1026_s26 = scalar_select %p48_p7, %s924_s14, %s50_s21  }
  0x17   : > { %p1028_p11 = por %p151_p10, %p63_p3  ;;  %s171_s28 = sand.u32 1, %s924_s14  }
  0x18   : > { %1255 = sst [smem:[#allocation17_spill]] %s1026_s26  ;;  %s1036_s29 = sshll.u32 %s171_s28, 3 }
  0x19   : > { %s1256_s27 = scalar_select %p1028_p11, 1, 0 }
  0x1a   : > { %s1039_s30 = sshll.u32 %s932_s16, 7  ;;  %p1043_p13 = pnand %p698_p12, %p1009_p4 }
  0x1b   : > { %s190_s5 = sand.u32 1, %s936_s17   ;;  %s1258_s1 = sld [smem:[#allocation18_spill]] }
  0x1c   : > { %s1257_s4 = scalar_select %p1043_p13, 1, 0 }
  0x1d   : > { %s194_s9 = scalar_lea.vmem [#allocation8], %s1036_s29  ;;  %s1059_s11 = scalar_lea.sflag [#allocation9], %s190_s5 }
  0x1e   : > { %s202_s10 = sshll.u32 %s194_s9, 4  ;;  %p1065_p3 = pneg %p1043_p13  ;;  %s1056_s10 = int_to_ptr.vmem [resolvable:$true] %s202_s10 }
  0x21   : > { %s1052_s8 = scalar_lea.hbm %s1258_s1, %s1039_s30  ;;  %s765_s6 = scalar_lea.hbm %s1258_s1, 1024 }
  0x22   : > { %s760_s19 = scalar_lea.hbm %s1052_s8, 128  ;;  %p766_p6 = scmp.lt.u32.totalorder %s1052_s8, %s1258_s1 }
  0x23   : > { %p761_p2 = scmp.ne.s32.totalorder %s1052_s8, %s760_s19  ;;  %p767_p7 = scmp.lt.u32.totalorder %s765_s6, %s760_s19 }
  0x24   : > { %p769_p12 = scmp.lt.u32.totalorder %s760_s19, %s1052_s8 }
  0x25   : > { %p763_p4 = pnand %p1065_p3, %p761_p2  ;;  %p768_p10 = por %p767_p7, %p766_p6 }
  0x27   : > { %p764_p5 = pneg %p763_p4  ;;  %p770_p0 = por %p769_p12, %p768_p10 }
  0x29   : > { %p771_p1 = pnand %p770_p0, %p764_p5 }
  0x2b   : > { %774 = shalt.err (!%p771_p1)
}
  0x2c   : > { %s775_s5 = scalar_lea.vmem %s1056_s10, 128  ;;  %s938_s22 = smov [#allocation8]  }
  0x2d   : > { %p776_p2 = scmp.ne.s32.totalorder %s1056_s10, %s775_s5  ;;  %s780_s23 = sshll.u32 %s938_s22, 4  ;;  %s781_s23 = int_to_ptr.vmem [resolvable:$false] %s780_s23 }
  0x2e   : > { %s782_s7 = scalar_lea.vmem %s781_s23, 256  ;;  %p783_p9 = scmp.lt.s32.totalorder %s1056_s10, %s781_s23 }
  0x2f   : > { %p778_p4 = pnand %p776_p2, %p1065_p3  ;;  %p784_p8 = scmp.lt.s32.totalorder %s782_s7, %s775_s5 }
  0x31   : > { %p779_p11 = pneg %p778_p4  ;;  %p785_p6 = por %p784_p8, %p783_p9 }
  0x33   : > { %p786_p7 = pnand %p785_p6, %p779_p11 }
  0x35   : > { %789 = shalt.err (!%p786_p7)
}
  0x36   : > { %690 = dma.hbm_to_vmem [thread:$0]  (!%p1043_p13), %s1052_s8, 128, %s1056_s10, %s1059_s11  }
  0x37   : > { %p1260_p0 = scmp.lt.s32.totalorder %s936_s17, 9  ;;  %p1261_p1 = scmp.ge.s32.totalorder %s936_s17, 1 }
  0x38   : > { %s1101_s5 = scalar_lea.hbm %s1240_s0, %s1039_s30  ;;  %s175_s22 = scalar_lea.vmem [#allocation5], %s1036_s29 }
  0x39   : > { %p1093_p5 = pnand %p1261_p1, %p1260_p0  ;;  %s183_s23 = sshll.u32 %s175_s22, 4  ;;  %s1104_s23 = int_to_ptr.vmem [resolvable:$true] %s183_s23 }
  0x3a   : > { %s1110_s7 = scalar_lea.hbm %s1242_s2, %s1039_s30  ;;  %s172_s1 = scalar_lea.sflag [#allocation6], %s171_s28 }
  0x3b   : > { %s1262_s19 = scalar_select %p1093_p5, 1, 0 }
  0x3c   : > { %s790_s20 = scalar_lea.hbm %s1101_s5, 128  ;;  %s795_s16 = scalar_lea.hbm %s1240_s0, 1024 }
  0x3d   : > { %p791_p8 = scmp.ne.s32.totalorder %s1101_s5, %s790_s20  ;;  %p796_p10 = scmp.lt.u32.totalorder %s1101_s5, %s1240_s0 }
  0x3e   : > { %p797_p12 = scmp.lt.u32.totalorder %s795_s16, %s790_s20  ;;  %p799_p4 = scmp.lt.u32.totalorder %s790_s20, %s1101_s5 }
  0x3f   : > { %p793_p9 = pnand %p791_p8, %p1065_p3 }
  0x40   : > { %p798_p2 = por %p797_p12, %p796_p10 }
  0x41   : > { %p794_p11 = pneg %p793_p9 }
  0x42   : > { %p800_p6 = por %p799_p4, %p798_p2 }
  0x44   : > { %p801_p7 = pnand %p800_p6, %p794_p11 }
  0x46   : > { %804 = shalt.err (!%p801_p7)
}
  0x47   : > { %s805_s28 = scalar_lea.vmem %s1104_s23, 128  ;;  %s939_s30 = smov [#allocation5]  }
  0x48   : > { %p806_p0 = scmp.ne.s32.totalorder %s1104_s23, %s805_s28  ;;  %s810_s8 = sshll.u32 %s939_s30, 4  ;;  %s811_s8 = int_to_ptr.vmem [resolvable:$false] %s810_s8 }
  0x49   : > { %s812_s26 = scalar_lea.vmem %s811_s8, 256  ;;  %p813_p9 = scmp.lt.s32.totalorder %s1104_s23, %s811_s8 }
  0x4a   : > { %p808_p1 = pnand %p806_p0, %p1065_p3  ;;  %p814_p5 = scmp.lt.s32.totalorder %s812_s26, %s805_s28 }
  0x4c   : > { %p809_p8 = pneg %p808_p1  ;;  %p815_p10 = por %p814_p5, %p813_p9 }
  0x4e   : > { %p816_p12 = pnand %p815_p10, %p809_p8 }
  0x50   : > { %819 = shalt.err (!%p816_p12)
}
  0x51   : > { %687 = dma.hbm_to_vmem [thread:$0]  (!%p1043_p13), %s1101_s5, 128, %s1104_s23, %s172_s1  }
  0x52   : > { %s213_s16 = scalar_lea.vmem [#allocation10], %s1036_s29  ;;  %s820_s10 = scalar_lea.hbm %s1110_s7, 128 }
  0x53   : > { %s221_s20 = sshll.u32 %s213_s16, 4  ;;  %p821_p11 = scmp.ne.s32.totalorder %s1110_s7, %s820_s10  ;;  %s222_s20 = int_to_ptr.vmem [resolvable:$true] %s221_s20 }
  0x54   : > { %s825_s22 = scalar_lea.hbm %s1242_s2, 1024  ;;  %p826_p4 = scmp.lt.u32.totalorder %s1110_s7, %s1242_s2 }
  0x55   : > { %p823_p5 = pnand %p821_p11, %p1065_p3  ;;  %p827_p6 = scmp.lt.u32.totalorder %s825_s22, %s820_s10 }
  0x56   : > { %p829_p0 = scmp.lt.u32.totalorder %s820_s10, %s1110_s7 }
  0x57   : > { %p824_p2 = pneg %p823_p5  ;;  %p828_p7 = por %p827_p6, %p826_p4 }
  0x59   : > { %p830_p1 = por %p829_p0, %p828_p7 }
  0x5b   : > { %p831_p8 = pnand %p830_p1, %p824_p2 }
  0x5d   : > { %834 = shalt.err (!%p831_p8)
}
  0x5e   : > { %s835_s1 = scalar_lea.vmem %s222_s20, 128  ;;  %s940_s29 = smov [#allocation10]  }
  0x5f   : > { %p836_p9 = scmp.ne.s32.totalorder %s222_s20, %s835_s1  ;;  %s840_s5 = sshll.u32 %s940_s29, 4  ;;  %s841_s5 = int_to_ptr.vmem [resolvable:$false] %s840_s5 }
  0x60   : > { %s842_s23 = scalar_lea.vmem %s841_s5, 256  ;;  %p843_p11 = scmp.lt.s32.totalorder %s222_s20, %s841_s5 }
  0x61   : > { %p838_p10 = pnand %p836_p9, %p1065_p3  ;;  %p844_p5 = scmp.lt.s32.totalorder %s842_s23, %s835_s1 }
  0x63   : > { %p839_p12 = pneg %p838_p10  ;;  %p845_p13 = por %p844_p5, %p843_p11 }
  0x65   : > { %p846_p4 = pnand %p845_p13, %p839_p12 }
  0x67   : > { %849 = shalt.err (!%p846_p4)
}
  0x68   : > { %p1263_p6 = scmp.ne.s32.totalorder %s1257_s4, 0  ;;  %p1264_p2 = scmp.ne.s32.totalorder %s1262_s19, 0 }
  0x69   : > { %s1157_s21 = sand.u32 (!%p1264_p2), 1, %s920_s13   ;;  %p1265_p13 = scmp.ne.s32.totalorder (!%p1264_p2), %s1253_s24, 0 }
  0x6a   : > { %693 = dma.hbm_to_vmem [thread:$0]  (!%p1263_p6), %s1110_s7, 128, %s222_s20, %s1059_s11  }
  0x6b   : > { %230 = sbr.rel (%p1264_p2) target bundleno = 932 (0x3a4), region = 32  ;;  %s1160_s8 = sshll.u32 (!%p1264_p2), %s1157_s21, 3 }
  0x6c   : > { %s233_s26 = scalar_lea.sflag (!%p1264_p2), [#allocation6], %s1157_s21  ;;  %s236_s16 = scalar_lea.vmem (!%p1264_p2), [#allocation5], %s1160_s8 }
  0x72   : > { %903 = dma.done.wait (%p1265_p13), %s233_s26, 128  }
  0x73   : > { %905 = vsyncadd (%p1265_p13), %s233_s26, 4294967168  ;;  %s241_s4 = sand.u32 1, %s997_s18   ;;  %s245_s19 = scalar_lea.vmem [#allocation8], %s1160_s8 }
  0x74   : > { %s242_s11 = scalar_lea.sflag [#allocation9], %s241_s4 }
  0x75   : > { %907 = dma.done.wait (%p1265_p13), %s242_s11, 256  }
  0x76   : > { %909 = vsyncadd (%p1265_p13), %s242_s11, 4294967040  ;;  %vm294_vm0 = vcmask 64512   ;;  %v941_v0 = vmov 0.0   ;;  %vm942_vm1 = vmmov 0   ;;  %v298_v1 = vld [vmem:[%s245_s19] sm:$0xff]  ;;  %v296_v2 = vld [vmem:[%s236_s16] sm:$0xff] }
  0x77   : > { %666 = vmatprep.subr.mxu0 %v941_v0  ;;  %295 = vst.msk [vmem:[#allocation4] sm:$0xff] %vm294_vm0, %v941_v0  ;;  %668 = vmatprep.mubr.msk.f32.mxu0 %vm942_vm1, %v941_v0  ;;  %v297_v3 = vmul.f32 0.35355338, %v296_v2  ;;  %vm291_vm2 = vcmask 7168   ;;  %v943_v4 = vmov -inf   ;;  %v944_v8 = vmov 0  }
  0x78   : > { %671 = vmatprep.subr.mxu1 %v941_v0  ;;  %673 = vmatprep.mubr.msk.f32.mxu1 %vm942_vm1, %v941_v0  ;;  %292 = vst.msk [vmem:[#allocation2] sm:$0xff] %vm291_vm2, %v943_v4  ;;  %293 = vst.msk [vmem:[#allocation3] sm:$0xff] %vm291_vm2, %v941_v0  ;;  %s254_s18 = scalar_lea.vmem [#allocation10], %s1160_s8  ;;  %s659_s24 = sshll.u32 %s928_s15, 7 }
  0x79   : > { %667 = vmatpush3.xpose.msk.msra.mxu0 %vm294_vm0, %v298_v1  ;;  %752 = vset.pattern.permute.xlu0 %v944_v8  ;;  %v299_v13 = vld [vmem:[%s254_s18] sm:$0xff]  ;;  %s286_s7 = scalar_lea.vmem [#allocation11], %s1160_s8  ;;  %s1191_s9 = scalar_lea.hbm %s1243_s3, %s659_s24 }
  0x7a   : > { %753 = vset.pattern.permute.xlu1 %v944_v8  ;;  %672 = vmatpush3.msra.mxu1 %v299_v13  ;;  %s512_s20 = sshll.u32 %s286_s7, 4  ;;  %s498_s22 = scalar_lea.sflag [#allocation7], %s1157_s21  ;;  %s1193_s20 = int_to_ptr.vmem [resolvable:$true] %s512_s20 }
  0x7b   : > { %s850_s28 = scalar_lea.vmem %s1193_s20, 128  ;;  %p1266_p7 = scmp.ne.s32.totalorder %s1254_s25, 0 }
  0x7c   : > { %669 = vmatmul.mubr.msk.f32.vlgmr.msra.gmra.mrb[0].mxu0 %vm294_vm0, %v297_v3  ;;  %p851_p3 = scmp.ne.s32.totalorder %s1193_s20, %s850_s28  ;;  %s945_s15 = smov [#allocation11]  }
  0x7d   : > { %s854_s30 = sshll.u32 %s945_s15, 4  ;;  %s855_s30 = int_to_ptr.vmem [resolvable:$false] %s854_s30 }
  0x7e   : > { %v474_v27 = vld [vmem:[#allocation4] sm:$0xff]  ;;  %p852_p0 = pnand %p851_p3, %p1266_p7  ;;  %s856_s1 = scalar_lea.vmem %s855_s30, 256 }
  0x7f   : > { %v377_v9 = vld [vmem:[#allocation2] sm:$0xff]  ;;  %v393_v21 = vld [vmem:[#allocation3] sm:$0xff]  ;;  %p857_p8 = scmp.lt.s32.totalorder %s1193_s20, %s855_s30  ;;  %p858_p9 = scmp.lt.s32.totalorder %s856_s1, %s850_s28 }
  0x80   : > { %p853_p1 = pneg %p852_p0 }
  0x81   : > { %p859_p10 = por %p858_p9, %p857_p8 }
  0x83   : > { %p860_p12 = pnand %p859_p10, %p853_p1 }
 0x14f   : > { %v373_v5 = vpop.f32.mrb[0].mxu0 }
 0x150   : > { %v670_v6 = vpop.f32.mrb[1].mxu0  ;;  %v378_v7 = vsel %vm294_vm0, %v373_v5, -inf }
 0x151   : > { %379 = vmax.xlane.f32.xlu0 %v378_v7 }
 0x1de   : > { %v380_v10 = vpop.xlane.xlu0 %379 }
 0x1df   : > { %v381_v11 = vmax.f32 %v377_v9, %v380_v10 }
 0x1e1   : > { %v382_v12 = vsub.f32 %v377_v9, %v381_v11  ;;  %483 = vst.msk [vmem:[#allocation2] sm:$0xff] %vm291_vm2, %v381_v11  ;;  %387 = vperm.xlu0 %752, %v381_v11  }
 0x1e3   : > { %v383_v19 = vmul.f32 1.442695, %v382_v12 }
 0x260   : > { %v388_v14 = vpop.permute.xlu0 %387 }
 0x261   : > { %v390_v15 = vsub.f32 %v373_v5, %v388_v14 }
 0x263   : > { %v391_v16 = vmul.f32 1.442695, %v390_v15 }
 0x265   : > { %754 = vpow2.f32 %v391_v16 }
 0x266   : > { %756 = vpow2.f32 %v383_v19 }
 0x26f   : > { %v755_v17 = vpop.eup %754 }
 0x270   : > { %674 = vmatmul.mubr.msk.f32.vlgmr.msra.gmra.mrb[0].mxu1 %vm294_vm0, %v755_v17  ;;  %v395_v18 = vsel %vm294_vm0, %v755_v17, 0.0  ;;  %v757_v20 = vpop.eup %756 }
 0x271   : > { %396 = vadd.xlane.f32.xlu1 %v395_v18  ;;  %v394_v22 = vmul.f32 %v757_v20, %v393_v21 }
 0x282   : > { %477 = vperm.xlu1 %753, %v757_v20  }
 0x2fe   : > { %v397_v23 = vpop.xlane.xlu1 %396 }
 0x2ff   : > { %v398_v24 = vadd.f32 %v397_v23, %v394_v22 }
 0x301   : > { %400 = vst.msk [vmem:[#allocation3] sm:$0xff] %vm291_vm2, %v398_v24 }
 0x302   : > { %v478_v28 = vpop.permute.xlu1 %477 }
 0x303   : > { %v480_v29 = vmul.f32 %v478_v28, %v474_v27 }
 0x308   : > { %v487_v25 = vld [vmem:[#allocation3] sm:$0xff] }
 0x309   : > { %758 = vrcp.f32 %v487_v25 }
 0x313   : > { %v759_v26 = vpop.eup %758 }
 0x314   : > { %492 = vperm.xlu1 %753, %v759_v26  }
 0x343   : > { %v470_v30 = vpop.f32.mrb[0].mxu1 }
 0x344   : > { %v481_v31 = vadd.f32 %v480_v29, %v470_v30  ;;  %v675_v32 = vpop.f32.mrb[1].mxu1 }
 0x346   : > { %482 = vst.msk [vmem:[#allocation4] sm:$0xff] %vm294_vm0, %v481_v31 }
 0x34d   : > { %v489_v33 = vld [vmem:[#allocation4] sm:$0xff] }
 0x393   : > { %v493_v34 = vpop.permute.xlu1 %492 }
 0x394   : > { %v495_v35 = vmul.f32 %v493_v34, %v489_v33 }
 0x396   : > { %496 = vst.msk [vmem:[%s286_s7] sm:$0xff] %vm294_vm0, %v495_v35 }
 0x397   : > { %863 = shalt.err (!%p860_p12)
}
 0x398   : > { %s864_s29 = scalar_lea.hbm %s1191_s9, 128  ;;  %s868_s21 = scalar_lea.hbm %s1243_s3, 1024 }
 0x399   : > { %p865_p11 = scmp.ne.s32.totalorder %s1191_s9, %s864_s29  ;;  %p869_p6 = scmp.lt.u32.totalorder %s1191_s9, %s1243_s3 }
 0x39a   : > { %p870_p2 = scmp.lt.u32.totalorder %s868_s21, %s864_s29  ;;  %p872_p3 = scmp.lt.u32.totalorder %s864_s29, %s1191_s9 }
 0x39b   : > { %p866_p5 = pnand %p865_p11, %p1266_p7 }
 0x39c   : > { %p871_p13 = por %p870_p2, %p869_p6 }
 0x39d   : > { %p867_p4 = pneg %p866_p5 }
 0x39e   : > { %p873_p0 = por %p872_p3, %p871_p13 }
 0x3a0   : > { %p874_p1 = pnand %p873_p0, %p867_p4 }
 0x3a2   : > { %877 = shalt.err (!%p874_p1)
}
 0x3a3   : > { %682 = dma.vmem_to_hbm [thread:$0]  (%p1266_p7), %s1193_s20, 128, %s1191_s9, %s498_s22  }
 0x3a4 PF: > { %p699_p8 = scmp.ge.s32.totalorder %s936_s17, 2  ;;  %s524_s16 = sand.u32 1, %s916_s12  }
 0x3a5   : > { %p1267_p9 = scmp.ne.s32.totalorder %s1256_s27, 0  ;;  %s525_s4 = scalar_lea.sflag [#allocation7], %s524_s16 }
 0x3a7   : > { %p695_p10 = pnand %p699_p8, %p1267_p9 }
 0x3a9   : > { %911 = dma.done.wait (!%p695_p10), %s525_s4, 128  }
 0x3aa   : > { %913 = vsyncadd (!%p695_p10), %s525_s4, 4294967168  ;;  %s22_s17 = sadd.s32 1, %s936_s17   ;;  %s1268_s25 = sld [smem:[#allocation17_spill]] }
 0x3ab   : > { %p19_p12 = scmp.ge.s32.totalorder %s22_s17, 10   ;;  %s1269_s15 = sld [smem:[#allocation15_spill]] }
 0x3ac   : > { %s1270_s16 = sld [smem:[#allocation16_spill]]  ;;  %s1271_s12 = smov %s920_s13 }
 0x3ad   : > { %s1272_s13 = smov %s924_s14  ;;  %21 = sbr.rel (!%p19_p12) target bundleno = 10 (0xa), region = 109 }
 0x3b0   : > { %s1273_s14 = smov %s1268_s25 }
 0x3b4   :  { %530 = vsyncpa [#allocation6], 1 }
 0x3b5   :  { %532 = vsyncpa [#allocation6 + $0x1], 1 }
 0x3b6   :  { %533 = vsyncpa [#allocation9], 1 }
 0x3b7   :  { %535 = vsyncpa [#allocation9 + $0x1], 1 }
 0x3b8   :  { %536 = vsyncpa [#allocation7], 1 }
 0x3b9   :  { %538 = vsyncpa [#allocation7 + $0x1], 1 }

</bundles_post_ra>
